<compile_context>
chip_gen: v7x
topology: tpu7x:2x2x1
jax: 0.10.0
libtpu: 0.0.40
codegen_flags: <defaults>
</compile_context>

<pallas_src>
import functools

import jax
import jax.numpy as jnp
from jax import lax
from jax.experimental import pallas as pl
from jax.experimental.pallas import tpu as pltpu


def _bh_triplet_kernel(emb_r_ref, emb_c_ref, lab_r_ref, lab_c_ref,
                       u_ref, v_ref,
                       tl_ref, valid_ref,
                       m_pos, m_neg,
                       *, margin, tile_r, tile_c):
    # All closed-over parameters are plain Python scalars (no traced constants).
    r = pl.program_id(0)
    c = pl.program_id(1)

    @pl.when(c == 0)
    def _():
        m_pos[...] = jnp.full_like(m_pos, -jnp.inf)
        m_neg[...] = jnp.full_like(m_neg, jnp.inf)

    er = emb_r_ref[...]                       # (TR, Dp) native dtype (f32 or bf16)
    ec = emb_c_ref[...]                       # (TC, Dp)

    # Gram tile on the MXU, contracting dim 1 of both operands (A @ B^T, no transpose).
    gram = lax.dot_general(er, ec, (((1,), (1,)), ((), ())),
                           preferred_element_type=jnp.float32)      # (TR, TC) f32

    # Squared distance tile.  D*eps^2 is folded into u in the wrapper; padded
    # columns carry v = +inf, so d2 = +inf there (excluded from the negative min
    # and keeps the has_neg sentinel exact).
    d2 = u_ref[...] + v_ref[...] - 2.0 * gram                        # (TR, TC) f32
    same = lab_r_ref[...] == lab_c_ref[...]                          # (TR, TC) bool

    # Hardest negative: different label (padded columns already +inf via v).
    neg_sel = jnp.where(same, jnp.inf, d2)
    m_neg[...] = jnp.minimum(m_neg[...], jnp.min(neg_sel, axis=1, keepdims=True))

    # Hardest positive: same label, excluding the self pair.  Only tiles that
    # actually intersect the diagonal pay for the iotas and the self mask.
    r0 = r * tile_r
    c0 = c * tile_c
    has_diag = jnp.logical_and(r0 < c0 + tile_c, c0 < r0 + tile_r)

    @pl.when(has_diag)
    def _():
        row_ids = r0 + lax.broadcasted_iota(jnp.int32, d2.shape, 0)
        col_ids = c0 + lax.broadcasted_iota(jnp.int32, d2.shape, 1)
        pos_sel = jnp.where(same & (row_ids != col_ids), d2, -jnp.inf)
        m_pos[...] = jnp.maximum(m_pos[...], jnp.max(pos_sel, axis=1, keepdims=True))

    @pl.when(jnp.logical_not(has_diag))
    def _():
        pos_sel = jnp.where(same, d2, -jnp.inf)
        m_pos[...] = jnp.maximum(m_pos[...], jnp.max(pos_sel, axis=1, keepdims=True))

    @pl.when(c == pl.num_programs(1) - 1)
    def _():
        hp2 = m_pos[...]                     # squared; -inf if no positive exists
        hn2 = m_neg[...]                     # squared; +inf if no negative exists
        valid = (hp2 > -jnp.inf) & (hn2 < jnp.inf)
        hp = jnp.sqrt(jnp.maximum(hp2, 0.0))         # clamp: -inf sentinel -> 0, no NaN
        hn = jnp.sqrt(jnp.maximum(hn2, 0.0))         # +inf stays +inf -> hinge clamps to 0
        tl = jnp.maximum(hp - hn + margin, 0.0)
        tl_ref[...] = jnp.where(valid, tl, 0.0)
        valid_ref[...] = valid.astype(jnp.float32)


def _round_up(x, m):
    return (x + m - 1) // m * m


def batch_hard_triplet_loss(embeddings, labels, margin=0.5, eps=1e-6):
    """embeddings: [B, D] float (f32 or bf16), labels: [B] int. Scalar f32 loss."""
    B, D = embeddings.shape

    # --- tile selection -------------------------------------------------------
    # small B: single 8/16-aligned tile.  medium B: tr=128 so the parallel row
    # axis gets >=2 blocks (v7x megacore).  large B: tr=256, tc=512 (streamed
    # column tile doubled to amortize per-step pipeline overhead).
    align = 16 if embeddings.dtype == jnp.bfloat16 else 8
    if B <= 128:
        tr = tc = _round_up(B, align)
    elif B <= 512:
        tr, tc = 128, 256
    else:
        tr, tc = 256, 512
    b_pad = _round_up(B, max(tr, tc))       # tc is a multiple of tr -> divides both
    d_pad = _round_up(D, 128)               # lane-aligned K dim (zero cols are inert)

    emb = embeddings
    lab = labels.astype(jnp.int32)
    if b_pad != B or d_pad != D:
        emb = jnp.pad(emb, ((0, b_pad - B), (0, d_pad - D)))
        # real person IDs are non-negative; -1 never matches a real label
        lab = jnp.pad(lab, (0, b_pad - B), constant_values=-1)

    # Per-row norm terms, computed once (tiny, fused by XLA).  D*eps^2 is folded
    # into u; padded columns get v = +inf so they are excluded from the negative
    # min inside the kernel for free.
    e32 = emb.astype(jnp.float32)
    sq = jnp.sum(e32 * e32, axis=1)
    s = jnp.sum(e32, axis=1)
    u = sq + 2.0 * eps * s + float(D) * eps * eps
    v = sq - 2.0 * eps * s
    col_pad = jnp.arange(b_pad) >= B
    v = jnp.where(col_pad, jnp.inf, v)
    u_col = u.reshape(b_pad, 1)
    v_row = v.reshape(1, b_pad)
    lab_col = lab.reshape(b_pad, 1)
    lab_row = lab.reshape(1, b_pad)

    kernel = functools.partial(
        _bh_triplet_kernel,
        margin=float(margin), tile_r=int(tr), tile_c=int(tc))

    itemsize = jnp.dtype(emb.dtype).itemsize
    n_row_blocks = b_pad // tr
    cost = pl.CostEstimate(
        flops=int(2 * b_pad * b_pad * d_pad + 6 * b_pad * b_pad),
        transcendentals=int(2 * b_pad),
        bytes_accessed=int(n_row_blocks * b_pad * d_pad * itemsize   # emb_c re-read per row block
                           + b_pad * d_pad * itemsize                # emb_r once
                           + n_row_blocks * b_pad * 8                # labels + u/v re-reads
                           + 2 * b_pad * 4))                         # outputs

    # VMEM: double-buffered inputs + outputs + scratch + (tr,tc) f32 temporaries.
    vmem_need = int(2 * (tr + tc) * d_pad * itemsize
                    + 2 * (tr + tc) * 8
                    + 2 * 2 * tr * 4
                    + 2 * tr * 4
                    + 8 * tr * tc * 4)
    vmem_limit = int(min(max(vmem_need, 32 * 1024 * 1024), 48 * 1024 * 1024))

    # NOTE: the (tr,1) per-row outputs are lane-sparse stores; kept as-is since the
    # write volume is tiny (2 * 4 bytes per row) and the column layout is known-good.
    tl, vld = pl.pallas_call(
        kernel,
        out_shape=(jax.ShapeDtypeStruct((b_pad, 1), jnp.float32),
                   jax.ShapeDtypeStruct((b_pad, 1), jnp.float32)),
        grid_spec=pltpu.PrefetchScalarGridSpec(
            num_scalar_prefetch=0,
            grid=(b_pad // tr, b_pad // tc),
            in_specs=[
                pl.BlockSpec((tr, d_pad), lambda r, c: (r, 0)),   # row embeddings
                pl.BlockSpec((tc, d_pad), lambda r, c: (c, 0)),   # col embeddings (streamed)
                pl.BlockSpec((tr, 1), lambda r, c: (r, 0)),       # labels (B,1)
                pl.BlockSpec((1, tc), lambda r, c: (0, c)),       # labels (1,B)
                pl.BlockSpec((tr, 1), lambda r, c: (r, 0)),       # u (row term)
                pl.BlockSpec((1, tc), lambda r, c: (0, c)),       # v (col term, +inf on pads)
            ],
            out_specs=[
                pl.BlockSpec((tr, 1), lambda r, c: (r, 0)),       # per-row hinge loss
                pl.BlockSpec((tr, 1), lambda r, c: (r, 0)),       # per-row valid flag
            ],
            scratch_shapes=[pltpu.VMEM((tr, 1), jnp.float32),     # running max (pos, squared)
                            pltpu.VMEM((tr, 1), jnp.float32)],    # running min (neg, squared)
        ),
        compiler_params=pltpu.CompilerParams(
            dimension_semantics=("parallel", "arbitrary"),
            vmem_limit_bytes=vmem_limit),
        cost_estimate=cost,
    )(emb, emb, lab_col, lab_row, u_col, v_row)

    tl = tl[:B, 0]
    vld = vld[:B, 0]
    count = jnp.sum(vld)
    return jnp.where(count > 0.0, jnp.sum(tl) / jnp.maximum(count, 1.0), 0.0)


def _reference_loss(embeddings, labels, margin=0.5, eps=1e-6):
    """Pure-JAX reference mirroring the PyTorch module exactly."""
    e = embeddings.astype(jnp.float32)
    B, _ = e.shape
    diff = e[:, None, :] - e[None, :, :] + eps
    dist = jnp.sqrt(jnp.sum(diff * diff, axis=-1))
    same = labels[:, None] == labels[None, :]
    not_self = ~jnp.eye(B, dtype=bool)
    pos_mask = same & not_self
    neg_mask = ~same
    hp = jnp.max(jnp.where(pos_mask, dist, -jnp.inf), axis=1)
    hn = jnp.min(jnp.where(neg_mask, dist, jnp.inf), axis=1)
    valid = jnp.any(pos_mask, axis=1) & jnp.any(neg_mask, axis=1)
    tl = jnp.maximum(hp - hn + margin, 0.0)
    loss_sum = jnp.sum(jnp.where(valid, tl, 0.0))
    count = jnp.sum(valid.astype(jnp.float32))
    return jnp.where(count > 0, loss_sum / jnp.maximum(count, 1.0), 0.0)


if __name__ == "__main__":
    key = jax.random.PRNGKey(0)
    k_emb, k_lab = jax.random.split(key)

    B, D = 8, 32   # D < 128 is lane-starved; the wrapper zero-pads D up to 128.
    embeddings = jax.random.normal(k_emb, (B, D), dtype=jnp.float32)
    labels = jax.random.randint(k_lab, (B,), 0, 3, dtype=jnp.int32)

    loss = batch_hard_triplet_loss(embeddings, labels, margin=0.5)
    loss = jax.block_until_ready(loss)

    ref = jax.block_until_ready(_reference_loss(embeddings, labels, margin=0.5))
    assert jnp.allclose(loss, ref, atol=1e-4, rtol=1e-4), (loss, ref)

    print("KERNEL_OK")
</pallas_src>

<mosaic_0001>
module attributes {stable_mosaic.version = 11 : i64} {
  func.func @_bh_triplet_kernel(%arg0: i32, %arg1: i32, %arg2: memref<8x128xf32, #tpu.memory_space<vmem>>, %arg3: memref<8x128xf32, #tpu.memory_space<vmem>>, %arg4: memref<8x1xi32, #tpu.memory_space<vmem>>, %arg5: memref<1x8xi32, #tpu.memory_space<vmem>>, %arg6: memref<8x1xf32, #tpu.memory_space<vmem>>, %arg7: memref<1x8xf32, #tpu.memory_space<vmem>>, %arg8: memref<8x1xf32, #tpu.memory_space<vmem>>, %arg9: memref<8x1xf32, #tpu.memory_space<vmem>>, %arg10: memref<8x1xf32, #tpu.memory_space<vmem>>, %arg11: memref<8x1xf32, #tpu.memory_space<vmem>>) attributes {dimension_semantics = [#tpu.dimension_semantics<parallel>, #tpu.dimension_semantics<arbitrary>], iteration_bounds = array<i64: 1, 1>, scalar_prefetch = 0 : i64, scratch_operands = 2 : i64, tpu.core_type = #tpu.core_type<tc>, window_params = [{transform_indices = @transform_0, window_bounds = array<i64: 8, 128>}, {transform_indices = @transform_1, window_bounds = array<i64: 8, 128>}, {transform_indices = @transform_2, window_bounds = array<i64: 8, 1>}, {transform_indices = @transform_3, window_bounds = array<i64: 1, 8>}, {transform_indices = @transform_4, window_bounds = array<i64: 8, 1>}, {transform_indices = @transform_5, window_bounds = array<i64: 1, 8>}, {transform_indices = @transform_6, window_bounds = array<i64: 8, 1>}, {transform_indices = @transform_7, window_bounds = array<i64: 8, 1>}]} {
    %c0_i32 = arith.constant 0 : i32
    %0 = arith.cmpi eq, %arg1, %c0_i32 : i32
    %1 = arith.extui %0 : i1 to i32
    %c0_i32_0 = arith.constant 0 : i32
    %2 = arith.cmpi ne, %1, %c0_i32_0 : i32
    scf.if %2 {
      %cst_26 = arith.constant 0xFF800000 : f32
      %41 = vector.broadcast %cst_26 : f32 to vector<8x1xf32>
      %c0_27 = arith.constant 0 : index
      %c0_28 = arith.constant 0 : index
      %42 = vector.load %arg10[%c0_27, %c0_28] : memref<8x1xf32, #tpu.memory_space<vmem>>, vector<8x1xf32>
      tpu.vector_store %arg10[%c0_27, %c0_28], %41 {strides = array<i32>} : memref<8x1xf32, #tpu.memory_space<vmem>>, vector<8x1xf32>,
      %cst_29 = arith.constant 0x7F800000 : f32
      %43 = vector.broadcast %cst_29 : f32 to vector<8x1xf32>
      %c0_30 = arith.constant 0 : index
      %c0_31 = arith.constant 0 : index
      %44 = vector.load %arg11[%c0_30, %c0_31] : memref<8x1xf32, #tpu.memory_space<vmem>>, vector<8x1xf32>
      tpu.vector_store %arg11[%c0_30, %c0_31], %43 {strides = array<i32>} : memref<8x1xf32, #tpu.memory_space<vmem>>, vector<8x1xf32>,
    } else {
    }
    %c0 = arith.constant 0 : index
    %c0_1 = arith.constant 0 : index
    %3 = vector.load %arg2[%c0, %c0_1] : memref<8x128xf32, #tpu.memory_space<vmem>>, vector<8x128xf32>
    %c0_2 = arith.constant 0 : index
    %c0_3 = arith.constant 0 : index
    %4 = vector.load %arg3[%c0_2, %c0_3] : memref<8x128xf32, #tpu.memory_space<vmem>>, vector<8x128xf32>
    %cst = arith.constant dense<0.000000e+00> : vector<8x8xf32>
    %5 = tpu.matmul %3, %4, %cst {dimension_numbers = #tpu.dot_dimension_numbers<[1], [1], [0], [0], [0, 0, 1, 0], [], []>} : vector<8x128xf32>, vector<8x128xf32>, vector<8x8xf32> -> vector<8x8xf32>
    %c0_4 = arith.constant 0 : index
    %c0_5 = arith.constant 0 : index
    %6 = vector.load %arg6[%c0_4, %c0_5] : memref<8x1xf32, #tpu.memory_space<vmem>>, vector<8x1xf32>
    %c0_6 = arith.constant 0 : index
    %c0_7 = arith.constant 0 : index
    %7 = vector.load %arg7[%c0_6, %c0_7] : memref<1x8xf32, #tpu.memory_space<vmem>>, vector<1x8xf32>
    %8 = vector.broadcast %6 : vector<8x1xf32> to vector<8x8xf32>
    %9 = vector.broadcast %7 : vector<1x8xf32> to vector<8x8xf32>
    %10 = arith.addf %8, %9 : vector<8x8xf32>
    %cst_8 = arith.constant 2.000000e+00 : f32
    %11 = vector.broadcast %cst_8 : f32 to vector<8x8xf32>
    %12 = arith.mulf %11, %5 : vector<8x8xf32>
    %13 = arith.subf %10, %12 : vector<8x8xf32>
    %c0_9 = arith.constant 0 : index
    %c0_10 = arith.constant 0 : index
    %14 = vector.load %arg4[%c0_9, %c0_10] : memref<8x1xi32, #tpu.memory_space<vmem>>, vector<8x1xi32>
    %c0_11 = arith.constant 0 : index
    %c0_12 = arith.constant 0 : index
    %15 = vector.load %arg5[%c0_11, %c0_12] : memref<1x8xi32, #tpu.memory_space<vmem>>, vector<1x8xi32>
    %16 = vector.broadcast %14 : vector<8x1xi32> to vector<8x8xi32>
    %17 = vector.broadcast %15 : vector<1x8xi32> to vector<8x8xi32>
    %18 = arith.cmpi eq, %16, %17 : vector<8x8xi32>
    %cst_13 = arith.constant 0x7F800000 : f32
    %19 = vector.broadcast %cst_13 : f32 to vector<8x8xf32>
    %20 = arith.select %18, %19, %13 : vector<8x8xi1>, vector<8x8xf32>
    %c0_14 = arith.constant 0 : index
    %c0_15 = arith.constant 0 : index
    %21 = vector.load %arg11[%c0_14, %c0_15] : memref<8x1xf32, #tpu.memory_space<vmem>>, vector<8x1xf32>
    %cst_16 = arith.constant dense<0x7F800000> : vector<8xf32>
    %22 = vector.multi_reduction <minimumf>, %20, %cst_16 [1] : vector<8x8xf32> to vector<8xf32>
    %23 = vector.shape_cast %22 : vector<8xf32> to vector<8x1xf32>
    %24 = arith.minimumf %21, %23 : vector<8x1xf32>
    %c0_17 = arith.constant 0 : index
    %c0_18 = arith.constant 0 : index
    %25 = vector.load %arg11[%c0_17, %c0_18] : memref<8x1xf32, #tpu.memory_space<vmem>>, vector<8x1xf32>
    tpu.vector_store %arg11[%c0_17, %c0_18], %24 {strides = array<i32>} : memref<8x1xf32, #tpu.memory_space<vmem>>, vector<8x1xf32>,
    %c8_i32 = arith.constant 8 : i32
    %26 = arith.muli %arg0, %c8_i32 : i32
    %c8_i32_19 = arith.constant 8 : i32
    %27 = arith.muli %arg1, %c8_i32_19 : i32
    %c8_i32_20 = arith.constant 8 : i32
    %28 = arith.addi %27, %c8_i32_20 : i32
    %29 = arith.cmpi slt, %26, %28 : i32
    %c8_i32_21 = arith.constant 8 : i32
    %30 = arith.addi %26, %c8_i32_21 : i32
    %31 = arith.cmpi slt, %27, %30 : i32
    %32 = arith.andi %29, %31 : i1
    %33 = arith.extui %32 : i1 to i32
    %c0_i32_22 = arith.constant 0 : i32
    %34 = arith.cmpi ne, %33, %c0_i32_22 : i32
    scf.if %34 {
      %41 = tpu.iota {dimensions = array<i32: 0>} : vector<8x8xi32>
      %42 = vector.broadcast %26 : i32 to vector<8x8xi32>
      %43 = arith.addi %42, %41 : vector<8x8xi32>
      %44 = tpu.iota {dimensions = array<i32: 1>} : vector<8x8xi32>
      %45 = vector.broadcast %27 : i32 to vector<8x8xi32>
      %46 = arith.addi %45, %44 : vector<8x8xi32>
      %47 = arith.cmpi ne, %43, %46 : vector<8x8xi32>
      %48 = arith.andi %18, %47 : vector<8x8xi1>
      %cst_26 = arith.constant 0xFF800000 : f32
      %49 = vector.broadcast %cst_26 : f32 to vector<8x8xf32>
      %50 = arith.select %48, %13, %49 : vector<8x8xi1>, vector<8x8xf32>
      %c0_27 = arith.constant 0 : index
      %c0_28 = arith.constant 0 : index
      %51 = vector.load %arg10[%c0_27, %c0_28] : memref<8x1xf32, #tpu.memory_space<vmem>>, vector<8x1xf32>
      %cst_29 = arith.constant dense<0xFF800000> : vector<8xf32>
      %52 = vector.multi_reduction <maximumf>, %50, %cst_29 [1] : vector<8x8xf32> to vector<8xf32>
      %53 = vector.shape_cast %52 : vector<8xf32> to vector<8x1xf32>
      %54 = arith.maximumf %51, %53 : vector<8x1xf32>
      %c0_30 = arith.constant 0 : index
      %c0_31 = arith.constant 0 : index
      %55 = vector.load %arg10[%c0_30, %c0_31] : memref<8x1xf32, #tpu.memory_space<vmem>>, vector<8x1xf32>
      tpu.vector_store %arg10[%c0_30, %c0_31], %54 {strides = array<i32>} : memref<8x1xf32, #tpu.memory_space<vmem>>, vector<8x1xf32>,
    } else {
    }
    %true = arith.constant true
    %35 = arith.xori %32, %true : i1
    %36 = arith.extui %35 : i1 to i32
    %c0_i32_23 = arith.constant 0 : i32
    %37 = arith.cmpi ne, %36, %c0_i32_23 : i32
    scf.if %37 {
      %cst_26 = arith.constant 0xFF800000 : f32
      %41 = vector.broadcast %cst_26 : f32 to vector<8x8xf32>
      %42 = arith.select %18, %13, %41 : vector<8x8xi1>, vector<8x8xf32>
      %c0_27 = arith.constant 0 : index
      %c0_28 = arith.constant 0 : index
      %43 = vector.load %arg10[%c0_27, %c0_28] : memref<8x1xf32, #tpu.memory_space<vmem>>, vector<8x1xf32>
      %cst_29 = arith.constant dense<0xFF800000> : vector<8xf32>
      %44 = vector.multi_reduction <maximumf>, %42, %cst_29 [1] : vector<8x8xf32> to vector<8xf32>
      %45 = vector.shape_cast %44 : vector<8xf32> to vector<8x1xf32>
      %46 = arith.maximumf %43, %45 : vector<8x1xf32>
      %c0_30 = arith.constant 0 : index
      %c0_31 = arith.constant 0 : index
      %47 = vector.load %arg10[%c0_30, %c0_31] : memref<8x1xf32, #tpu.memory_space<vmem>>, vector<8x1xf32>
      tpu.vector_store %arg10[%c0_30, %c0_31], %46 {strides = array<i32>} : memref<8x1xf32, #tpu.memory_space<vmem>>, vector<8x1xf32>,
    } else {
    }
    %c0_i32_24 = arith.constant 0 : i32
    %38 = arith.cmpi eq, %arg1, %c0_i32_24 : i32
    %39 = arith.extui %38 : i1 to i32
    %c0_i32_25 = arith.constant 0 : i32
    %40 = arith.cmpi ne, %39, %c0_i32_25 : i32
    scf.if %40 {
      %c0_26 = arith.constant 0 : index
      %c0_27 = arith.constant 0 : index
      %41 = vector.load %arg10[%c0_26, %c0_27] : memref<8x1xf32, #tpu.memory_space<vmem>>, vector<8x1xf32>
      %c0_28 = arith.constant 0 : index
      %c0_29 = arith.constant 0 : index
      %42 = vector.load %arg11[%c0_28, %c0_29] : memref<8x1xf32, #tpu.memory_space<vmem>>, vector<8x1xf32>
      %cst_30 = arith.constant 0xFF800000 : f32
      %43 = vector.broadcast %cst_30 : f32 to vector<8x1xf32>
      %44 = arith.cmpf ogt, %41, %43 : vector<8x1xf32>
      %cst_31 = arith.constant 0x7F800000 : f32
      %45 = vector.broadcast %cst_31 : f32 to vector<8x1xf32>
      %46 = arith.cmpf olt, %42, %45 : vector<8x1xf32>
      %47 = arith.andi %44, %46 : vector<8x1xi1>
      %cst_32 = arith.constant 0.000000e+00 : f32
      %48 = vector.broadcast %cst_32 : f32 to vector<8x1xf32>
      %49 = arith.maximumf %41, %48 : vector<8x1xf32>
      %50 = math.sqrt %49 : vector<8x1xf32>
      %cst_33 = arith.constant 0.000000e+00 : f32
      %51 = vector.broadcast %cst_33 : f32 to vector<8x1xf32>
      %52 = arith.maximumf %42, %51 : vector<8x1xf32>
      %53 = math.sqrt %52 : vector<8x1xf32>
      %54 = arith.subf %50, %53 : vector<8x1xf32>
      %cst_34 = arith.constant 5.000000e-01 : f32
      %55 = vector.broadcast %cst_34 : f32 to vector<8x1xf32>
      %56 = arith.addf %54, %55 : vector<8x1xf32>
      %cst_35 = arith.constant 0.000000e+00 : f32
      %57 = vector.broadcast %cst_35 : f32 to vector<8x1xf32>
      %58 = arith.maximumf %56, %57 : vector<8x1xf32>
      %cst_36 = arith.constant 0.000000e+00 : f32
      %59 = vector.broadcast %cst_36 : f32 to vector<8x1xf32>
      %60 = arith.select %47, %58, %59 : vector<8x1xi1>, vector<8x1xf32>
      %c0_37 = arith.constant 0 : index
      %c0_38 = arith.constant 0 : index
      %61 = vector.load %arg8[%c0_37, %c0_38] : memref<8x1xf32, #tpu.memory_space<vmem>>, vector<8x1xf32>
      tpu.vector_store %arg8[%c0_37, %c0_38], %60 {strides = array<i32>} : memref<8x1xf32, #tpu.memory_space<vmem>>, vector<8x1xf32>,
      %62 = arith.extui %47 : vector<8x1xi1> to vector<8x1xi32>
      %63 = arith.sitofp %62 : vector<8x1xi32> to vector<8x1xf32>
      %c0_39 = arith.constant 0 : index
      %c0_40 = arith.constant 0 : index
      %64 = vector.load %arg9[%c0_39, %c0_40] : memref<8x1xf32, #tpu.memory_space<vmem>>, vector<8x1xf32>
      tpu.vector_store %arg9[%c0_39, %c0_40], %63 {strides = array<i32>} : memref<8x1xf32, #tpu.memory_space<vmem>>, vector<8x1xf32>,
    } else {
    }
    return
  }
  func.func @transform_0(%arg0: i32, %arg1: i32) -> (i32, i32) {
    %c0_i32 = arith.constant 0 : i32
    %c0_i32_0 = arith.constant 0 : i32
    return %arg0, %c0_i32 : i32, i32
  }
  func.func @transform_1(%arg0: i32, %arg1: i32) -> (i32, i32) {
    %c0_i32 = arith.constant 0 : i32
    %c0_i32_0 = arith.constant 0 : i32
    return %arg1, %c0_i32 : i32, i32
  }
  func.func @transform_2(%arg0: i32, %arg1: i32) -> (i32, i32) {
    %c0_i32 = arith.constant 0 : i32
    %c0_i32_0 = arith.constant 0 : i32
    return %arg0, %c0_i32 : i32, i32
  }
  func.func @transform_3(%arg0: i32, %arg1: i32) -> (i32, i32) {
    %c0_i32 = arith.constant 0 : i32
    %c0_i32_0 = arith.constant 0 : i32
    return %c0_i32, %arg1 : i32, i32
  }
  func.func @transform_4(%arg0: i32, %arg1: i32) -> (i32, i32) {
    %c0_i32 = arith.constant 0 : i32
    %c0_i32_0 = arith.constant 0 : i32
    return %arg0, %c0_i32 : i32, i32
  }
  func.func @transform_5(%arg0: i32, %arg1: i32) -> (i32, i32) {
    %c0_i32 = arith.constant 0 : i32
    %c0_i32_0 = arith.constant 0 : i32
    return %c0_i32, %arg1 : i32, i32
  }
  func.func @transform_6(%arg0: i32, %arg1: i32) -> (i32, i32) {
    %c0_i32 = arith.constant 0 : i32
    %c0_i32_0 = arith.constant 0 : i32
    return %arg0, %c0_i32 : i32, i32
  }
  func.func @transform_7(%arg0: i32, %arg1: i32) -> (i32, i32) {
    %c0_i32 = arith.constant 0 : i32
    %c0_i32_0 = arith.constant 0 : i32
    return %arg0, %c0_i32 : i32, i32
  }
}

</mosaic_0001>

<bundles_post_ra>
// kernel: tpu_custom_call.1
= control target key start
LH: loop header
LB: loop body
LE: loop exit
PB: predicated region body
PF: predicated region fallthrough
CT: control target
= control target key end

     0   :  { %v236_v0 = vmov 0.0   ;;  %vm237_vm0 = vmmov 0   ;;  %v238_v4 = vmov 0   ;;  %vm29_vm1 = vcmask 7168   ;;  %s319_s1 = inlined_call_operand.vmem [shape: f32[8,128], index: 1, kind: input, shape index: {}]   ;;  %s320_s0 = inlined_call_operand.vmem [shape: f32[8,128], index: 0, kind: input, shape index: {}]   ;;  %s321_s4 = inlined_call_operand.vmem [shape: f32[8,1], index: 4, kind: input, shape index: {}]   ;;  %s322_s2 = inlined_call_operand.vmem [shape: s32[8,1], index: 2, kind: input, shape index: {}]   ;;  %s323_s5 = inlined_call_operand.vmem [shape: f32[1,8], index: 5, kind: input, shape index: {}]   ;;  %s324_s3 = inlined_call_operand.vmem [shape: s32[1,8], index: 3, kind: input, shape index: {}]   ;;  %s325_s7 = inlined_call_operand.vmem [shape: f32[8,1], index: 7, kind: output, shape index: {1}]   ;;  %s326_s6 = inlined_call_operand.vmem [shape: f32[8,1], index: 6, kind: output, shape index: {0}]  }
   0x1   :  { %221 = vmatprep.subr.mxu0 %v236_v0  ;;  %v33_v1 = vld [vmem:[%s319_s1] sm:$0xff]  ;;  %223 = vmatprep.mubr.msk.f32.mxu0 %vm237_vm0, %v236_v0  ;;  %v239_v6 = vmov inf   ;;  %v149_v8 = vlaneseq  ;;  %vm132_vm4 = vcmask 64512   ;;  %v240_v23 = vmov -inf  }
   0x2   :  { %v104_v2 = vld [vmem:[%s321_s4] sm:$0xff]  ;;  %222 = vmatpush3.xpose.msra.mxu0 %v33_v1  ;;  %231 = vset.pattern.permute.xlu0 %v238_v4  ;;  %31 = vst.msk [vmem:[#allocation3] sm:$0xff] %vm29_vm1, %v239_v6  ;;  %30 = vst.msk [vmem:[#allocation2] sm:$0xff] %vm29_vm1, %v240_v23 }
   0x3   :  { %v32_v3 = vld [vmem:[%s320_s0] sm:$0xff]  ;;  %108 = vperm.xlu0 %231, %v104_v2   ;;  %v150_v11 = vshrl.u32 %v149_v8, 7  ;;  %v154_v12 = vand.u32 127, %v149_v8 }
   0x4   :  { %v120_v5 = vld [vmem:[%s322_s2] sm:$0xff] }
   0x5   :  { %224 = vmatmul.mubr.f32.vlgmr.msra.gmra.mrb[0].mxu0 %v32_v3  ;;  %v216_v9 = vld [vmem:[%s323_s5] ss:$0 sm:$0xff]  ;;  %vm157_vm2 = vcmp.ne.s32.totalorder %v150_v11, %v154_v12 }
   0x6   :  { %v217_v13 = vld [vmem:[%s324_s3] ss:$0 sm:$0xff] }
   0x7   :  { %123 = vperm.xlu0 %231, %v120_v5  }
   0x9   :  { %v131_v24 = vld [vmem:[#allocation3] sm:$0xff]  ;;  %v160_v27 = vld [vmem:[#allocation2] sm:$0xff] }
  0x82   :  { %v109_v7 = vpop.permute.xlu0 %108 }
  0x83   :  { %v117_v10 = vadd.f32 %v216_v9, %v109_v7 }
  0x86   :  { %v124_v14 = vpop.permute.xlu0 %123 }
  0x87   :  { %vm129_vm3 = vcmp.eq.s32.totalorder %v124_v14, %v217_v13 }
  0x88   :  { %vm158_vm5 = vmand %vm129_vm3, %vm157_vm2 }
  0xd8   :  { %v100_v15 = vpop.f32.mrb[0].mxu0 }
  0xd9   :  { %v118_v16 = vmul.f32 2.0, %v100_v15  ;;  %v225_v17 = vpop.f32.mrb[1].mxu0 }
  0xdb   :  { %v119_v18 = vsub.f32 %v117_v10, %v118_v16 }
  0xdd   :  { %v130_v19 = vsel %vm129_vm3, inf, %v119_v18  ;;  %v159_v21 = vsel %vm158_vm5, %v119_v18, -inf }
  0xde   :  { %v133_v20 = vsel %vm132_vm4, %v130_v19, inf  ;;  %v161_v22 = vsel %vm132_vm4, %v159_v21, -inf }
  0xdf   :  { %134 = vmin.xlane.f32.xlu1 %v133_v20 }
  0xe3   :  { %162 = vmax.xlane.f32.xlu1 %v161_v22 }
 0x16c   :  { %v135_v25 = vpop.xlane.xlu1 %134 }
 0x16d   :  { %v136_v26 = vmin.f32 %v131_v24, %v135_v25 }
 0x16f   :  { %138 = vst.msk [vmem:[#allocation3] sm:$0xff] %vm29_vm1, %v136_v26 }
 0x170   :  { %v163_v28 = vpop.xlane.xlu1 %162 }
 0x171   :  { %v164_v29 = vmax.f32 %v160_v27, %v163_v28 }
 0x173   :  { %165 = vst.msk [vmem:[#allocation2] sm:$0xff] %vm29_vm1, %v164_v29 }
 0x176   :  { %v180_v30 = vld [vmem:[#allocation3] sm:$0xff] }
 0x177   :  { %v192_v31 = vmax.f32 %v180_v30, 0.0  ;;  %vm182_vm6 = vcmp.lt.f32.partialorder %v180_v30, inf }
 0x179   :  { %232 = vrsqrt.f32 %v192_v31  ;;  %vm195_vm9 = vcmp.eq.f32.partialorder %v192_v31, inf  ;;  %v198_v41 = vand.u32 2147483648, %v192_v31  ;;  %vm197_vm11 = vcmp.eq.f32.partialorder %v192_v31, 0.0 }
 0x17a   :  { %v179_v32 = vld [vmem:[#allocation2] sm:$0xff] }
 0x17b   :  { %vm181_vm7 = vcmp.gt.f32.partialorder %v179_v32, -inf  ;;  %v184_v33 = vmax.f32 %v179_v32, 0.0 }
 0x17c   :  { %vm303_vm8 = vmand %vm181_vm7, %vm182_vm6 }
 0x17d   :  { %234 = vrsqrt.f32 %v184_v33  ;;  %v218_v35 = vsel %vm303_vm8, 1.0, %v236_v0  ;;  %vm187_vm10 = vcmp.eq.f32.partialorder %v184_v33, inf  ;;  %v190_v42 = vand.u32 2147483648, %v184_v33 }
 0x17e   :  { %207 = vst.msk [vmem:[%s325_s7] sm:$0xff] %vm29_vm1, %v218_v35  ;;  %vm189_vm12 = vcmp.eq.f32.partialorder %v184_v33, 0.0 }
 0x183   :  { %v233_v36 = vpop.eup %232 }
 0x184   :  { %v194_v37 = vmul.f32 %v233_v36, %v192_v31 }
 0x186   :  { %v196_v39 = vsel %vm195_vm9, %v192_v31, %v194_v37 }
 0x187   :  { %v235_v38 = vpop.eup %234  ;;  %v199_v44 = vsel %vm197_vm11, %v198_v41, %v196_v39 }
 0x188   :  { %v186_v40 = vmul.f32 %v235_v38, %v184_v33 }
 0x18a   :  { %v188_v43 = vsel %vm187_vm10, %v184_v33, %v186_v40 }
 0x18b   :  { %v191_v45 = vsel %vm189_vm12, %v190_v42, %v188_v43 }
 0x18c   :  { %v200_v46 = vsub.f32 %v191_v45, %v199_v44 }
 0x18e   :  { %v201_v47 = vadd.f32 0.5, %v200_v46 }
 0x190   :  { %v202_v48 = vmax.f32 %v201_v47, 0.0 }
 0x192   :  { %v203_v49 = vsel %vm303_vm8, %v202_v48, 0.0 }
 0x193   :  { %204 = vst.msk [vmem:[%s326_s6] sm:$0xff] %vm29_vm1, %v203_v49 }

</bundles_post_ra>
